<compile_context>
chip_gen: v7x
topology: tpu7x:2x2x1
jax: 0.10.0
libtpu: 0.0.40
codegen_flags: <defaults>
</compile_context>

<pallas_src>
import jax
import jax.numpy as jnp
from jax.experimental import pallas as pl
from jax.experimental.pallas import tpu as pltpu

_LANE = 128


def _round_up(a, b):
    return (a + b - 1) // b * b


def _make_sigmoid_threshold_kernel(threshold):
    thr = float(threshold)  # baked-in constant: no SMEM scalar operand

    def kernel(x_ref, prob_ref, pred_ref):
        x = x_ref[...].astype(jnp.float32)
        # Exact f32 sigmoid (bit-exact preds at the 0.5 boundary).
        probs = 1.0 / (1.0 + jnp.exp(-x))
        prob_ref[...] = probs.astype(prob_ref.dtype)
        pred_ref[...] = (probs > thr).astype(pred_ref.dtype)

    return kernel


def base_video_model_infer(
    x,
    threshold=0.5,
    *,
    probs_dtype=None,          # None -> same dtype as x (pass bf16 to halve traffic)
    preds_dtype=jnp.int8,      # bandwidth-optimal; use jnp.float32 for torch `.float()`
    lane_block=1024,           # lane tile, multiple of 128 -> unmasked vst
    tile_budget_bytes=8 << 20, # per-step tile bytes (x2 with double buffering)
    vmem_limit_bytes=32 << 20, # safe on v5e/v6e/v7x (<= v7x 64 MiB physical)
):
    """Inference-mode forward implied by BaseVideoModel (sigmoid + threshold).

    x: float logits of any shape (e.g. NCHW video frames).
    Returns (probs, preds) with the same shape as x.
    """
    orig_shape = x.shape
    in_dtype = jnp.dtype(x.dtype)
    probs_dtype = in_dtype if probs_dtype is None else jnp.dtype(probs_dtype)
    preds_dtype = jnp.dtype(preds_dtype)

    n = x.size
    lane = max(_LANE, _round_up(int(lane_block), _LANE))
    rows = pl.cdiv(n, lane)

    itemsizes = (in_dtype.itemsize, probs_dtype.itemsize, preds_dtype.itemsize)
    # Sublane granularity for the narrowest dtype in flight: 8 (f32), 16 (bf16), 32 (int8).
    sublane = 32 // min(itemsizes)

    bytes_per_row = lane * sum(itemsizes)
    row_tile = max(sublane, (tile_budget_bytes // bytes_per_row) // sublane * sublane)
    row_tile = min(row_tile, _round_up(rows, sublane))

    rows_pad = _round_up(rows, row_tile)
    n_pad = rows_pad * lane

    x_flat = x.reshape(-1)
    if n_pad != n:
        x_flat = jnp.pad(x_flat, (0, n_pad - n))  # zeros: sigmoid(0)=0.5 -> pred 0, discarded
    x2d = x_flat.reshape(rows_pad, lane)

    grid = (rows_pad // row_tile,)
    kernel = _make_sigmoid_threshold_kernel(threshold)

    probs2d, preds2d = pl.pallas_call(
        kernel,
        out_shape=(
            jax.ShapeDtypeStruct((rows_pad, lane), probs_dtype),
            jax.ShapeDtypeStruct((rows_pad, lane), preds_dtype),
        ),
        grid=grid,
        in_specs=[pl.BlockSpec((row_tile, lane), lambda i: (i, 0))],
        out_specs=(
            pl.BlockSpec((row_tile, lane), lambda i: (i, 0)),
            pl.BlockSpec((row_tile, lane), lambda i: (i, 0)),
        ),
        compiler_params=pltpu.CompilerParams(
            dimension_semantics=("parallel",),   # lets v7x split the loop across its 2 TCs
            vmem_limit_bytes=vmem_limit_bytes,
        ),
    )(x2d)

    probs = probs2d.reshape(-1)[:n].reshape(orig_shape)
    preds = preds2d.reshape(-1)[:n].reshape(orig_shape)
    return probs, preds


if __name__ == "__main__":
    # Deterministic small example consistent with a video-frame batch:
    # batch=2, channels=4, spatial=16x16 (NCHW).
    key = jax.random.PRNGKey(0)
    x = jax.random.normal(key, (2, 4, 16, 16), dtype=jnp.float32)

    # Bandwidth-optimized path (int8 preds, recommended default).
    probs, preds = base_video_model_infer(x, threshold=0.5)
    # Torch-faithful path: `(probs > 0.5).float()` -> float32 preds.
    probs_f, preds_f = base_video_model_infer(x, threshold=0.5, preds_dtype=jnp.float32)
    jax.block_until_ready((probs, preds, probs_f, preds_f))

    # Plain-JAX reference (same formula as the kernel -> bit-exact preds).
    ref_probs = 1.0 / (1.0 + jnp.exp(-x))
    ref_preds = ref_probs > 0.5

    assert probs.shape == x.shape and preds.shape == x.shape
    assert jnp.allclose(probs, ref_probs, atol=1e-6), "prob mismatch"
    assert jnp.allclose(probs, jax.nn.sigmoid(x), atol=1e-5), "prob vs jax.nn.sigmoid mismatch"
    assert jnp.array_equal(preds, ref_preds.astype(jnp.int8)), "int8 pred mismatch"
    assert jnp.allclose(probs_f, ref_probs, atol=1e-6), "prob mismatch (f32 pred path)"
    assert jnp.array_equal(preds_f, ref_preds.astype(jnp.float32)), "f32 pred mismatch"

    print("KERNEL_OK")
</pallas_src>

<mosaic_0001>
module attributes {stable_mosaic.version = 11 : i64} {
  func.func @kernel(%arg0: i32, %arg1: memref<32x1024xf32, #tpu.memory_space<vmem>>, %arg2: memref<32x1024xf32, #tpu.memory_space<vmem>>, %arg3: memref<32x1024xi8, #tpu.memory_space<vmem>>) attributes {dimension_semantics = [#tpu.dimension_semantics<parallel>], iteration_bounds = array<i64: 1>, scalar_prefetch = 0 : i64, scratch_operands = 0 : i64, tpu.core_type = #tpu.core_type<tc>, window_params = [{transform_indices = @transform_0, window_bounds = array<i64: 32, 1024>}, {transform_indices = @transform_1, window_bounds = array<i64: 32, 1024>}, {transform_indices = @transform_2, window_bounds = array<i64: 32, 1024>}]} {
    %c0 = arith.constant 0 : index
    %c0_0 = arith.constant 0 : index
    %0 = vector.load %arg1[%c0, %c0_0] : memref<32x1024xf32, #tpu.memory_space<vmem>>, vector<32x1024xf32>
    %cst = arith.constant 0.000000e+00 : f32
    %1 = vector.broadcast %cst : f32 to vector<32x1024xf32>
    %2 = arith.subf %1, %0 : vector<32x1024xf32>
    %3 = math.exp %2 : vector<32x1024xf32>
    %cst_1 = arith.constant 1.000000e+00 : f32
    %4 = vector.broadcast %cst_1 : f32 to vector<32x1024xf32>
    %5 = arith.addf %4, %3 : vector<32x1024xf32>
    %cst_2 = arith.constant 1.000000e+00 : f32
    %6 = vector.broadcast %cst_2 : f32 to vector<32x1024xf32>
    %7 = arith.divf %6, %5 : vector<32x1024xf32>
    %c0_3 = arith.constant 0 : index
    %c0_4 = arith.constant 0 : index
    %8 = vector.load %arg2[%c0_3, %c0_4] : memref<32x1024xf32, #tpu.memory_space<vmem>>, vector<32x1024xf32>
    tpu.vector_store %arg2[%c0_3, %c0_4], %7 {strides = array<i32>} : memref<32x1024xf32, #tpu.memory_space<vmem>>, vector<32x1024xf32>,
    %cst_5 = arith.constant 5.000000e-01 : f32
    %9 = vector.broadcast %cst_5 : f32 to vector<32x1024xf32>
    %10 = arith.cmpf ogt, %7, %9 : vector<32x1024xf32>
    %11 = arith.extui %10 : vector<32x1024xi1> to vector<32x1024xi8>
    %c0_6 = arith.constant 0 : index
    %c0_7 = arith.constant 0 : index
    %12 = vector.load %arg3[%c0_6, %c0_7] : memref<32x1024xi8, #tpu.memory_space<vmem>>, vector<32x1024xi8>
    tpu.vector_store %arg3[%c0_6, %c0_7], %11 {strides = array<i32>} : memref<32x1024xi8, #tpu.memory_space<vmem>>, vector<32x1024xi8>,
    return
  }
  func.func @transform_0(%arg0: i32) -> (i32, i32) {
    %c0_i32 = arith.constant 0 : i32
    %c0_i32_0 = arith.constant 0 : i32
    return %arg0, %c0_i32 : i32, i32
  }
  func.func @transform_1(%arg0: i32) -> (i32, i32) {
    %c0_i32 = arith.constant 0 : i32
    %c0_i32_0 = arith.constant 0 : i32
    return %arg0, %c0_i32 : i32, i32
  }
  func.func @transform_2(%arg0: i32) -> (i32, i32) {
    %c0_i32 = arith.constant 0 : i32
    %c0_i32_0 = arith.constant 0 : i32
    return %arg0, %c0_i32 : i32, i32
  }
}

</mosaic_0001>

<bundles_post_ra>
// kernel: tpu_custom_call.1
= control target key start
LH: loop header
LB: loop body
LE: loop exit
PB: predicated region body
PF: predicated region fallthrough
CT: control target
= control target key end

     0   :  { %8 = vsyncpa [#allocation3], 0  ;;  %s832_s0 = inlined_call_operand.hbm [shape: f32[32,1024], index: 0, kind: input, shape index: {}]   ;;  %s833_s1 = inlined_call_operand.hbm [shape: f32[32,1024], index: 1, kind: output, shape index: {0}]   ;;  %s834_s2 = inlined_call_operand.hbm [shape: s8[32,1024], index: 2, kind: output, shape index: {1}]  }
   0x1   :  { %9 = vsyncpa [#allocation4], 0 }
   0x2   :  { %10 = vsyncpa [#allocation7], 0  ;;  %s593_s9 = smov [#allocation2]   ;;  %s521_s13 = scalar_lea.hbm %s832_s0, 4096 }
   0x3   :  { %s16_s10 = sshll.u32 %s593_s9, 4  ;;  %p522_p0 = scmp.ne.s32.totalorder %s832_s0, %s521_s13  ;;  %s17_s10 = int_to_ptr.vmem [resolvable:$true] %s16_s10 }
   0x4   :  { %p525_p1 = scmp.lt.u32.totalorder %s521_s13, %s832_s0 }
   0x6   :  { %p527_p2 = pnand %p525_p1, %p522_p0 }
   0x8   :  { %530 = shalt.err (!%p527_p2)
}
   0x9   :  { %s531_s18 = scalar_lea.vmem %s17_s10, 4096  ;;  %p536_p4 = scmp.lt.s32.totalorder %s17_s10, %s17_s10 }
   0xa   :  { %p532_p3 = scmp.ne.s32.totalorder %s17_s10, %s531_s18  ;;  %p537_p5 = scmp.lt.s32.totalorder %s531_s18, %s531_s18 }
   0xc   :  { %p538_p6 = por %p537_p5, %p536_p4 }
   0xe   :  { %p539_p7 = pnand %p538_p6, %p532_p3 }
  0x10   :  { %542 = shalt.err (!%p539_p7)
}
  0x11   :  { %s594_s19 = smov 1024   ;;  %s595_s20 = smov 64  }
  0x12   :  { %22 = dma.hbm_to_vmem [thread:$0]  %s832_s0, 4096, %s17_s10, [#allocation3], %s594_s19, %s594_s19, %s595_s20  }
  0x13   :  { %587 = dma.done.wait [#allocation3], 4096  }
  0x14   :  { %588 = vsyncadd [#allocation3], 4294963200  ;;  %v28_v0 = vld [vmem:[#allocation2] sm:$0xff]  ;;  %v29_v1 = vld [vmem:[#allocation2 + $0x8] sm:$0xff]  ;;  %s597_s0 = smov [#allocation5]  }
  0x15   :  { %v30_v2 = vld [vmem:[#allocation2 + $0x10] sm:$0xff]  ;;  %v60_v3 = vsub.f32 0.0, %v28_v0  ;;  %v61_v4 = vsub.f32 0.0, %v29_v1  ;;  %v31_v6 = vld [vmem:[#allocation2 + $0x18] sm:$0xff]  ;;  %v32_v7 = vld [vmem:[#allocation2 + $0x20] sm:$0xff]  ;;  %s361_s23 = sshll.u32 %s597_s0, 4  ;;  %s761_s23 = int_to_ptr.vmem [resolvable:$true] %s361_s23 }
  0x16   :  { %v62_v5 = vsub.f32 0.0, %v30_v2  ;;  %v33_v8 = vld [vmem:[#allocation2 + $0x28] sm:$0xff]  ;;  %v63_v9 = vsub.f32 0.0, %v31_v6  ;;  %v64_v10 = vsub.f32 0.0, %v32_v7  ;;  %v34_v12 = vld [vmem:[#allocation2 + $0x30] sm:$0xff]  ;;  %v35_v13 = vld [vmem:[#allocation2 + $0x38] sm:$0xff]  ;;  %p548_p9 = scmp.lt.s32.totalorder %s761_s23, %s761_s23 }
  0x17   :  { %v65_v11 = vsub.f32 0.0, %v33_v8  ;;  %v36_v14 = vld [vmem:[#allocation2 + $0x40] sm:$0xff]  ;;  %v92_v15 = vmul.f32 1.442695, %v60_v3  ;;  %v94_v16 = vmul.f32 1.442695, %v61_v4 }
  0x18   :  { %v96_v17 = vmul.f32 1.442695, %v62_v5  ;;  %v98_v18 = vmul.f32 1.442695, %v63_v9  ;;  %v100_v19 = vmul.f32 1.442695, %v64_v10 }
  0x19   :  { %393 = vpow2.f32 %v92_v15  ;;  %v66_v20 = vsub.f32 0.0, %v34_v12  ;;  %v67_v21 = vsub.f32 0.0, %v35_v13  ;;  %v68_v22 = vsub.f32 0.0, %v36_v14  ;;  %v37_v23 = vld [vmem:[#allocation2 + $0x48] sm:$0xff]  ;;  %v38_v24 = vld [vmem:[#allocation2 + $0x50] sm:$0xff]  ;;  %v39_v25 = vld [vmem:[#allocation2 + $0x58] sm:$0xff] }
  0x1a   :  { %395 = vpow2.f32 %v94_v16  ;;  %v102_v26 = vmul.f32 1.442695, %v65_v11  ;;  %v69_v27 = vsub.f32 0.0, %v37_v23  ;;  %v40_v28 = vld [vmem:[#allocation2 + $0x60] sm:$0xff]  ;;  %v70_v30 = vsub.f32 0.0, %v38_v24  ;;  %v41_v50 = vld [vmem:[#allocation2 + $0x68] sm:$0xff] }
  0x1b   :  { %397 = vpow2.f32 %v96_v17  ;;  %v104_v29 = vmul.f32 1.442695, %v66_v20  ;;  %v106_v31 = vmul.f32 1.442695, %v67_v21  ;;  %v71_v32 = vsub.f32 0.0, %v39_v25  ;;  %v42_v53 = vld [vmem:[#allocation2 + $0x70] sm:$0xff] }
  0x1c   :  { %399 = vpow2.f32 %v98_v18  ;;  %v108_v33 = vmul.f32 1.442695, %v68_v22  ;;  %v72_v34 = vsub.f32 0.0, %v40_v28  ;;  %v110_v35 = vmul.f32 1.442695, %v69_v27  ;;  %v43_v56 = vld [vmem:[#allocation2 + $0x78] sm:$0xff] }
  0x1d   :  { %401 = vpow2.f32 %v100_v19  ;;  %v112_v36 = vmul.f32 1.442695, %v70_v30  ;;  %v114_v37 = vmul.f32 1.442695, %v71_v32  ;;  %v73_v59 = vsub.f32 0.0, %v41_v50  ;;  %v44_v60 = vld [vmem:[#allocation2 + $0x80] sm:$0xff] }
  0x1e   :  { %403 = vpow2.f32 %v102_v26  ;;  %v116_v38 = vmul.f32 1.442695, %v72_v34  ;;  %v74_v63 = vsub.f32 0.0, %v42_v53  ;;  %v45_v0 = vld [vmem:[#allocation2 + $0x88] sm:$0xff]  ;;  %v75_v3 = vsub.f32 0.0, %v43_v56  ;;  %v46_v4 = vld [vmem:[#allocation2 + $0x90] sm:$0xff] }
  0x1f   :  { %405 = vpow2.f32 %v104_v29  ;;  %v76_v7 = vsub.f32 0.0, %v44_v60  ;;  %v47_v8 = vld [vmem:[#allocation2 + $0x98] sm:$0xff]  ;;  %v118_v11 = vmul.f32 1.442695, %v73_v59  ;;  %v77_v12 = vsub.f32 0.0, %v45_v0  ;;  %v48_v13 = vld [vmem:[#allocation2 + $0xa0] sm:$0xff] }
  0x20   :  { %407 = vpow2.f32 %v106_v31  ;;  %v120_v16 = vmul.f32 1.442695, %v74_v63  ;;  %v78_v17 = vsub.f32 0.0, %v46_v4  ;;  %v49_v18 = vld [vmem:[#allocation2 + $0xa8] sm:$0xff]  ;;  %v122_v20 = vmul.f32 1.442695, %v75_v3 }
  0x21   :  { %409 = vpow2.f32 %v108_v33  ;;  %v79_v21 = vsub.f32 0.0, %v47_v8  ;;  %v50_v22 = vld [vmem:[#allocation2 + $0xb0] sm:$0xff]  ;;  %v124_v24 = vmul.f32 1.442695, %v76_v7  ;;  %v80_v25 = vsub.f32 0.0, %v48_v13  ;;  %v51_v26 = vld [vmem:[#allocation2 + $0xb8] sm:$0xff] }
  0x22   :  { %411 = vpow2.f32 %v110_v35  ;;  %v126_v28 = vmul.f32 1.442695, %v77_v12  ;;  %v81_v29 = vsub.f32 0.0, %v49_v18  ;;  %v52_v30 = vld [vmem:[#allocation2 + $0xc0] sm:$0xff]  ;;  %v128_v32 = vmul.f32 1.442695, %v78_v17 }
  0x23   :  { %v394_v39 = vpop.eup %393  ;;  %413 = vpow2.f32 %v112_v36  ;;  %v82_v33 = vsub.f32 0.0, %v50_v22  ;;  %v53_v34 = vld [vmem:[#allocation2 + $0xc8] sm:$0xff]  ;;  %v130_v36 = vmul.f32 1.442695, %v79_v21  ;;  %v54_v0 = vld [vmem:[#allocation2 + $0xd0] sm:$0xff]  ;;  %v55_v3 = vld [vmem:[#allocation2 + $0xd8] sm:$0xff] }
  0x24   :  { %v396_v40 = vpop.eup %395  ;;  %v156_v41 = vadd.f32 1.0, %v394_v39  ;;  %415 = vpow2.f32 %v114_v37  ;;  %v83_v37 = vsub.f32 0.0, %v51_v26  ;;  %v132_v39 = vmul.f32 1.442695, %v80_v25  ;;  %s543_s24 = scalar_lea.vmem %s761_s23, 4096 }
  0x25   :  { %v398_v42 = vpop.eup %397  ;;  %v157_v43 = vadd.f32 1.0, %v396_v40  ;;  %417 = vpow2.f32 %v116_v38  ;;  %v84_v40 = vsub.f32 0.0, %v52_v30  ;;  %v87_v13 = vsub.f32 0.0, %v55_v3  ;;  %p544_p8 = scmp.ne.s32.totalorder %s761_s23, %s543_s24  ;;  %p549_p10 = scmp.lt.s32.totalorder %s543_s24, %s543_s24 }
  0x26   :  { %v400_v44 = vpop.eup %399  ;;  %419 = vrcp.f32 %v156_v41  ;;  %v158_v45 = vadd.f32 1.0, %v398_v42  ;;  %v134_v42 = vmul.f32 1.442695, %v81_v29 }
  0x27   :  { %v402_v46 = vpop.eup %401  ;;  %421 = vrcp.f32 %v157_v43  ;;  %v159_v47 = vadd.f32 1.0, %v400_v44  ;;  %v85_v43 = vsub.f32 0.0, %v53_v34  ;;  %p550_p11 = por %p549_p10, %p548_p9 }
  0x28   :  { %v404_v48 = vpop.eup %403  ;;  %423 = vrcp.f32 %v158_v45  ;;  %v160_v49 = vadd.f32 1.0, %v402_v46  ;;  %v136_v45 = vmul.f32 1.442695, %v82_v33  ;;  %v146_v33 = vmul.f32 1.442695, %v87_v13 }
  0x29   :  { %v406_v51 = vpop.eup %405  ;;  %425 = vrcp.f32 %v159_v47  ;;  %v161_v52 = vadd.f32 1.0, %v404_v48  ;;  %v138_v47 = vmul.f32 1.442695, %v83_v37  ;;  %p551_p12 = pnand %p550_p11, %p544_p8 }
  0x2a   :  { %v408_v54 = vpop.eup %407  ;;  %427 = vrcp.f32 %v160_v49  ;;  %v162_v55 = vadd.f32 1.0, %v406_v51  ;;  %v140_v49 = vmul.f32 1.442695, %v84_v40  ;;  %v142_v51 = vmul.f32 1.442695, %v85_v43 }
  0x2b   :  { %v410_v57 = vpop.eup %409  ;;  %429 = vrcp.f32 %v161_v52  ;;  %v163_v58 = vadd.f32 1.0, %v408_v54 }
  0x2c   :  { %v412_v61 = vpop.eup %411  ;;  %431 = vrcp.f32 %v162_v55  ;;  %v164_v62 = vadd.f32 1.0, %v410_v57 }
  0x2d   :  { %v414_v1 = vpop.eup %413  ;;  %433 = vrcp.f32 %v163_v58  ;;  %v165_v2 = vadd.f32 1.0, %v412_v61 }
  0x2e   :  { %v416_v5 = vpop.eup %415  ;;  %435 = vrcp.f32 %v164_v62  ;;  %v166_v6 = vadd.f32 1.0, %v414_v1 }
  0x2f   :  { %v418_v9 = vpop.eup %417  ;;  %437 = vrcp.f32 %v165_v2  ;;  %v167_v10 = vadd.f32 1.0, %v416_v5 }
  0x30   :  { %v629_v14 = vpop.eup %419  ;;  %439 = vrcp.f32 %v166_v6  ;;  %v168_v15 = vadd.f32 1.0, %v418_v9  ;;  %v56_v6 = vld [vmem:[#allocation2 + $0xe0] sm:$0xff]  ;;  %v86_v9 = vsub.f32 0.0, %v54_v0 }
  0x31   :  { %v631_v19 = vpop.eup %421  ;;  %252 = vst [vmem:[#allocation5] sm:$0xff] %v629_v14  ;;  %441 = vrcp.f32 %v167_v10  ;;  %v57_v10 = vld [vmem:[#allocation2 + $0xe8] sm:$0xff]  ;;  %v88_v18 = vsub.f32 0.0, %v56_v6  ;;  %vm284_vm0 = vcmp.gt.f32.partialorder %v629_v14, 0.5 }
  0x32   :  { %v634_v23 = vpop.eup %423  ;;  %253 = vst [vmem:[#allocation5 + $0x8] sm:$0xff] %v631_v19  ;;  %443 = vrcp.f32 %v168_v15  ;;  %v58_v15 = vld [vmem:[#allocation2 + $0xf0] sm:$0xff]  ;;  %vm285_vm2 = vcmp.gt.f32.partialorder %v631_v19, 0.5 }
  0x33   :  { %v637_v27 = vpop.eup %425  ;;  %254 = vst [vmem:[#allocation5 + $0x10] sm:$0xff] %v634_v23  ;;  %445 = vpow2.f32 %v118_v11  ;;  %v90_v29 = vsub.f32 0.0, %v58_v15  ;;  %v148_v37 = vmul.f32 1.442695, %v88_v18  ;;  %vm286_vm14 = vcmp.gt.f32.partialorder %v634_v23, 0.5 }
  0x34   :  { %v640_v31 = vpop.eup %427  ;;  %255 = vst [vmem:[#allocation5 + $0x18] sm:$0xff] %v637_v27  ;;  %447 = vpow2.f32 %v120_v16 }
  0x35   :  { %v643_v35 = vpop.eup %429  ;;  %256 = vst [vmem:[#allocation5 + $0x20] sm:$0xff] %v640_v31  ;;  %449 = vpow2.f32 %v122_v20  ;;  %v59_v20 = vld [vmem:[#allocation2 + $0xf8] sm:$0xff]  ;;  %v152_v43 = vmul.f32 1.442695, %v90_v29 }
  0x36   :  { %v646_v38 = vpop.eup %431  ;;  %257 = vst [vmem:[#allocation5 + $0x28] sm:$0xff] %v643_v35  ;;  %451 = vpow2.f32 %v124_v24  ;;  %v89_v24 = vsub.f32 0.0, %v57_v10  ;;  %v91_v34 = vsub.f32 0.0, %v59_v20 }
  0x37   :  { %v649_v41 = vpop.eup %433  ;;  %258 = vst [vmem:[#allocation5 + $0x30] sm:$0xff] %v646_v38  ;;  %453 = vpow2.f32 %v126_v28  ;;  %v144_v28 = vmul.f32 1.442695, %v86_v9 }
  0x38   :  { %v652_v44 = vpop.eup %435  ;;  %259 = vst [vmem:[#allocation5 + $0x38] sm:$0xff] %v649_v41  ;;  %455 = vpow2.f32 %v128_v32  ;;  %v150_v40 = vmul.f32 1.442695, %v89_v24 }
  0x39   :  { %v655_v46 = vpop.eup %437  ;;  %260 = vst [vmem:[#allocation5 + $0x40] sm:$0xff] %v652_v44  ;;  %457 = vpow2.f32 %v130_v36  ;;  %vm292_vm1 = vcmp.gt.f32.partialorder %v652_v44, 0.5 }
  0x3a   :  { %v658_v48 = vpop.eup %439  ;;  %261 = vst [vmem:[#allocation5 + $0x48] sm:$0xff] %v655_v46  ;;  %459 = vpow2.f32 %v132_v39  ;;  %vm293_vm3 = vcmp.gt.f32.partialorder %v655_v46, 0.5  ;;  %vm699_vm5 = vmpackc.low %vm292_vm1, %vm284_vm0  ;;  %vm287_vm0 = vcmp.gt.f32.partialorder %v637_v27, 0.5 }
  0x3b   :  { %v661_v50 = vpop.eup %441  ;;  %262 = vst [vmem:[#allocation5 + $0x50] sm:$0xff] %v658_v48  ;;  %461 = vpow2.f32 %v134_v42  ;;  %vm703_vm8 = vmpackc.low %vm293_vm3, %vm285_vm2  ;;  %vm294_vm15 = vcmp.gt.f32.partialorder %v658_v48, 0.5  ;;  %vm288_vm2 = vcmp.gt.f32.partialorder %v640_v31, 0.5 }
  0x3c   :  { %v664_v52 = vpop.eup %443  ;;  %263 = vst [vmem:[#allocation5 + $0x58] sm:$0xff] %v661_v50  ;;  %463 = vpow2.f32 %v136_v45  ;;  %vm295_vm1 = vcmp.gt.f32.partialorder %v661_v50, 0.5 }
  0x3d   :  { %v446_v53 = vpop.eup %445  ;;  %264 = vst [vmem:[#allocation5 + $0x60] sm:$0xff] %v664_v52  ;;  %465 = vpow2.f32 %v138_v47  ;;  %v154_v47 = vmul.f32 1.442695, %v91_v34  ;;  %vm296_vm3 = vcmp.gt.f32.partialorder %v664_v52, 0.5 }
  0x3e   :  { %v448_v54 = vpop.eup %447  ;;  %v169_v55 = vadd.f32 1.0, %v446_v53  ;;  %467 = vpow2.f32 %v140_v49 }
  0x3f   :  { %v450_v56 = vpop.eup %449  ;;  %v170_v57 = vadd.f32 1.0, %v448_v54  ;;  %469 = vpow2.f32 %v142_v51 }
  0x40   :  { %v452_v58 = vpop.eup %451  ;;  %471 = vrcp.f32 %v169_v55  ;;  %v171_v59 = vadd.f32 1.0, %v450_v56 }
  0x41   :  { %v454_v60 = vpop.eup %453  ;;  %473 = vrcp.f32 %v170_v57  ;;  %v172_v61 = vadd.f32 1.0, %v452_v58 }
  0x42   :  { %v456_v62 = vpop.eup %455  ;;  %475 = vrcp.f32 %v171_v59  ;;  %v173_v63 = vadd.f32 1.0, %v454_v60 }
  0x43   :  { %v458_v1 = vpop.eup %457  ;;  %477 = vrcp.f32 %v172_v61  ;;  %v174_v2 = vadd.f32 1.0, %v456_v62  ;;  %v596_v62 = vmov 0  }
  0x44   :  { %v460_v4 = vpop.eup %459  ;;  %479 = vrcp.f32 %v173_v63  ;;  %v175_v5 = vadd.f32 1.0, %v458_v1 }
  0x45   :  { %v462_v7 = vpop.eup %461  ;;  %481 = vrcp.f32 %v174_v2  ;;  %v176_v8 = vadd.f32 1.0, %v460_v4 }
  0x46   :  { %v464_v11 = vpop.eup %463  ;;  %483 = vrcp.f32 %v175_v5  ;;  %v177_v12 = vadd.f32 1.0, %v462_v7 }
  0x47   :  { %v466_v16 = vpop.eup %465  ;;  %485 = vrcp.f32 %v176_v8  ;;  %v178_v17 = vadd.f32 1.0, %v464_v11 }
  0x48   :  { %v468_v21 = vpop.eup %467  ;;  %487 = vrcp.f32 %v177_v12  ;;  %v179_v22 = vadd.f32 1.0, %v466_v16 }
  0x49   :  { %v470_v25 = vpop.eup %469  ;;  %489 = vrcp.f32 %v178_v17  ;;  %v180_v26 = vadd.f32 1.0, %v468_v21 }
  0x4a   :  { %v668_v30 = vpop.eup %471  ;;  %491 = vrcp.f32 %v179_v22  ;;  %v181_v32 = vadd.f32 1.0, %v470_v25 }
  0x4b   :  { %v670_v36 = vpop.eup %473  ;;  %265 = vst [vmem:[#allocation5 + $0x68] sm:$0xff] %v668_v30  ;;  %493 = vrcp.f32 %v180_v26 }
  0x4c   :  { %v673_v39 = vpop.eup %475  ;;  %266 = vst [vmem:[#allocation5 + $0x70] sm:$0xff] %v670_v36  ;;  %495 = vrcp.f32 %v181_v32 }
  0x4d   :  { %v478_v42 = vpop.eup %477  ;;  %267 = vst [vmem:[#allocation5 + $0x78] sm:$0xff] %v673_v39  ;;  %497 = vpow2.f32 %v144_v28 }
  0x4e   :  { %v480_v45 = vpop.eup %479  ;;  %268 = vst [vmem:[#allocation5 + $0x80] sm:$0xff] %v478_v42  ;;  %499 = vpow2.f32 %v146_v33  ;;  %vm300_vm4 = vcmp.gt.f32.partialorder %v478_v42, 0.5 }
  0x4f   :  { %v677_v49 = vpop.eup %481  ;;  %269 = vst [vmem:[#allocation5 + $0x88] sm:$0xff] %v480_v45  ;;  %501 = vpow2.f32 %v148_v37  ;;  %vm301_vm7 = vcmp.gt.f32.partialorder %v480_v45, 0.5 }
  0x50   :  { %v679_v51 = vpop.eup %483  ;;  %270 = vst [vmem:[#allocation5 + $0x90] sm:$0xff] %v677_v49  ;;  %503 = vpow2.f32 %v150_v40 }
  0x51   :  { %v682_v53 = vpop.eup %485  ;;  %271 = vst [vmem:[#allocation5 + $0x98] sm:$0xff] %v679_v51  ;;  %505 = vpow2.f32 %v152_v43 }
  0x52   :  { %v685_v54 = vpop.eup %487  ;;  %272 = vst [vmem:[#allocation5 + $0xa0] sm:$0xff] %v682_v53  ;;  %507 = vpow2.f32 %v154_v47 }
  0x53   :  { %v690_v55 = vpop.eup %489  ;;  %273 = vst [vmem:[#allocation5 + $0xa8] sm:$0xff] %v685_v54 }
  0x54   :  { %v695_v56 = vpop.eup %491  ;;  %274 = vst [vmem:[#allocation5 + $0xb0] sm:$0xff] %v690_v55 }
  0x55   :  { %v494_v57 = vpop.eup %493  ;;  %275 = vst [vmem:[#allocation5 + $0xb8] sm:$0xff] %v695_v56 }
  0x56   :  { %v496_v44 = vpop.eup %495  ;;  %276 = vst [vmem:[#allocation5 + $0xc0] sm:$0xff] %v494_v57  ;;  %vm308_vm6 = vcmp.gt.f32.partialorder %v494_v57, 0.5 }
  0x57   :  { %v498_v46 = vpop.eup %497  ;;  %277 = vst [vmem:[#allocation5 + $0xc8] sm:$0xff] %v496_v44  ;;  %vm317_vm9 = vmpackc.low %vm308_vm6, %vm300_vm4  ;;  %vm309_vm10 = vcmp.gt.f32.partialorder %v496_v44, 0.5  ;;  %vm297_vm6 = vcmp.gt.f32.partialorder %v668_v30, 0.5 }
  0x58   :  { %v500_v58 = vpop.eup %499  ;;  %v182_v59 = vadd.f32 1.0, %v498_v46  ;;  %vm318_vm11 = vmpackc.even %vm317_vm9, %vm699_vm5  ;;  %vm289_vm5 = vcmp.gt.f32.partialorder %v643_v35, 0.5  ;;  %vm298_vm9 = vcmp.gt.f32.partialorder %v670_v36, 0.5 }
  0x59   :  { %v502_v60 = vpop.eup %501  ;;  %v183_v61 = vadd.f32 1.0, %v500_v58  ;;  %v340_v63 = vsel %vm318_vm11, 16843009, %v596_v62  ;;  %vm320_vm12 = vmpackc.low %vm309_vm10, %vm301_vm7  ;;  %vm302_vm10 = vcmp.gt.f32.partialorder %v677_v49, 0.5 }
  0x5a   :  { %v504_v0 = vpop.eup %503  ;;  %509 = vrcp.f32 %v182_v59  ;;  %v184_v1 = vadd.f32 1.0, %v502_v60  ;;  %348 = vst [vmem:[#allocation6] sm:$0xff] %v340_v63  ;;  %vm321_vm13 = vmpackc.even %vm320_vm12, %vm703_vm8  ;;  %vm290_vm8 = vcmp.gt.f32.partialorder %v646_v38, 0.5  ;;  %vm291_vm12 = vcmp.gt.f32.partialorder %v649_v41, 0.5 }
  0x5b   :  { %v506_v2 = vpop.eup %505  ;;  %511 = vrcp.f32 %v183_v61  ;;  %v185_v3 = vadd.f32 1.0, %v504_v0  ;;  %v341_v4 = vsel %vm321_vm13, 16843009, %v596_v62  ;;  %vm719_vm4 = vmpackc.low %vm294_vm15, %vm286_vm14  ;;  %vm299_vm13 = vcmp.gt.f32.partialorder %v673_v39, 0.5 }
  0x5c   :  { %v508_v5 = vpop.eup %507  ;;  %513 = vrcp.f32 %v184_v1  ;;  %v186_v6 = vadd.f32 1.0, %v506_v2  ;;  %349 = vst [vmem:[#allocation6 + $0x8] sm:$0xff] %v341_v4  ;;  %vm725_vm7 = vmpackc.low %vm295_vm1, %vm287_vm0  ;;  %vm303_vm0 = vcmp.gt.f32.partialorder %v679_v51, 0.5 }
  0x5d   :  { %515 = vrcp.f32 %v185_v3  ;;  %v187_v7 = vadd.f32 1.0, %v508_v5  ;;  %vm732_vm11 = vmpackc.low %vm296_vm3, %vm288_vm2 }
  0x5e   :  { %517 = vrcp.f32 %v186_v6  ;;  %vm738_vm14 = vmpackc.low %vm297_vm6, %vm289_vm5 }
  0x5f   :  { %519 = vrcp.f32 %v187_v7  ;;  %vm743_vm1 = vmpackc.low %vm298_vm9, %vm290_vm8  ;;  %vm304_vm8 = vcmp.gt.f32.partialorder %v682_v53, 0.5 }
  0x60   :  { %vm751_vm5 = vmpackc.low %vm299_vm13, %vm291_vm12  ;;  %vm305_vm12 = vcmp.gt.f32.partialorder %v685_v54, 0.5 }
  0x64   :  { %v510_v31 = vpop.eup %509 }
  0x65   :  { %v512_v48 = vpop.eup %511  ;;  %278 = vst [vmem:[#allocation5 + $0xd0] sm:$0xff] %v510_v31  ;;  %vm310_vm15 = vcmp.gt.f32.partialorder %v510_v31, 0.5 }
  0x66   :  { %v514_v50 = vpop.eup %513  ;;  %279 = vst [vmem:[#allocation5 + $0xd8] sm:$0xff] %v512_v48  ;;  %vm323_vm2 = vmpackc.low %vm310_vm15, %vm302_vm10  ;;  %vm311_vm3 = vcmp.gt.f32.partialorder %v512_v48, 0.5 }
  0x67   :  { %v516_v9 = vpop.eup %515  ;;  %280 = vst [vmem:[#allocation5 + $0xe0] sm:$0xff] %v514_v50  ;;  %vm324_vm6 = vmpackc.even %vm323_vm2, %vm719_vm4  ;;  %vm312_vm9 = vcmp.gt.f32.partialorder %v514_v50, 0.5 }
  0x68   :  { %v518_v10 = vpop.eup %517  ;;  %281 = vst [vmem:[#allocation5 + $0xe8] sm:$0xff] %v516_v9  ;;  %v342_v11 = vsel %vm324_vm6, 16843009, %v596_v62  ;;  %vm326_vm10 = vmpackc.low %vm311_vm3, %vm303_vm0  ;;  %vm313_vm13 = vcmp.gt.f32.partialorder %v516_v9, 0.5 }
  0x69   :  { %v520_v41 = vpop.eup %519  ;;  %282 = vst [vmem:[#allocation5 + $0xf0] sm:$0xff] %v518_v10  ;;  %350 = vst [vmem:[#allocation6 + $0x10] sm:$0xff] %v342_v11  ;;  %vm314_vm2 = vcmp.gt.f32.partialorder %v518_v10, 0.5 }
  0x6a   :  { %vm327_vm4 = vmpackc.even %vm326_vm10, %vm725_vm7  ;;  %283 = vst [vmem:[#allocation5 + $0xf8] sm:$0xff] %v520_v41  ;;  %vm306_vm7 = vcmp.gt.f32.partialorder %v690_v55, 0.5 }
  0x6b   :  { %v343_v12 = vsel %vm327_vm4, 16843009, %v596_v62  ;;  %vm769_vm15 = vmpackc.low %vm312_vm9, %vm304_vm8 }
  0x6c   :  { %351 = vst [vmem:[#allocation6 + $0x18] sm:$0xff] %v343_v12  ;;  %vm330_vm0 = vmpackc.even %vm769_vm15, %vm732_vm11 }
  0x6d   :  { %554 = shalt.err (!%p551_p12)
}
  0x6e   :  { %s555_s27 = scalar_lea.hbm %s833_s1, 4096 }
  0x6f   :  { %p556_p13 = scmp.ne.s32.totalorder %s833_s1, %s555_s27  ;;  %p559_p0 = scmp.lt.u32.totalorder %s555_s27, %s833_s1 }
  0x71   :  { %p561_p1 = pnand %p559_p0, %p556_p13 }
  0x73   :  { %564 = shalt.err (!%p561_p1)
}
  0x74   :  { %367 = dma.vmem_to_hbm [thread:$0]  %s761_s23, 4096, %s833_s1, [#allocation4], %s594_s19, %s594_s19, %s595_s20   ;;  %v344_v15 = vsel %vm330_vm0, 16843009, %v596_v62  ;;  %vm332_vm3 = vmpackc.low %vm313_vm13, %vm305_vm12  ;;  %vm307_vm8 = vcmp.gt.f32.partialorder %v695_v56, 0.5  ;;  %vm315_vm9 = vcmp.gt.f32.partialorder %v520_v41, 0.5 }
  0x75   :  { %352 = vst [vmem:[#allocation6 + $0x20] sm:$0xff] %v344_v15  ;;  %vm333_vm6 = vmpackc.even %vm332_vm3, %vm738_vm14  ;;  %s598_s1 = smov [#allocation6]  }
  0x76   :  { %v345_v16 = vsel %vm333_vm6, 16843009, %v596_v62  ;;  %vm335_vm10 = vmpackc.low %vm314_vm2, %vm306_vm7  ;;  %s374_s6 = sshll.u32 %s598_s1, 4  ;;  %s375_s6 = int_to_ptr.vmem [resolvable:$true] %s374_s6 }
  0x77   :  { %353 = vst [vmem:[#allocation6 + $0x28] sm:$0xff] %v345_v16  ;;  %vm336_vm11 = vmpackc.even %vm335_vm10, %vm743_vm1  ;;  %s565_s7 = scalar_lea.vmem %s375_s6, 1024  ;;  %p570_p3 = scmp.lt.s32.totalorder %s375_s6, %s375_s6 }
  0x78   :  { %v346_v17 = vsel %vm336_vm11, 16843009, %v596_v62  ;;  %vm338_vm4 = vmpackc.low %vm315_vm9, %vm307_vm8  ;;  %p566_p2 = scmp.ne.s32.totalorder %s375_s6, %s565_s7  ;;  %p571_p4 = scmp.lt.s32.totalorder %s565_s7, %s565_s7 }
  0x79   :  { %354 = vst [vmem:[#allocation6 + $0x30] sm:$0xff] %v346_v17  ;;  %vm339_vm14 = vmpackc.even %vm338_vm4, %vm751_vm5 }
  0x7a   :  { %v347_v18 = vsel %vm339_vm14, 16843009, %v596_v62  ;;  %p572_p5 = por %p571_p4, %p570_p3 }
  0x7b   :  { %355 = vst [vmem:[#allocation6 + $0x38] sm:$0xff] %v347_v18 }
  0x7c   :  { %p573_p6 = pnand %p572_p5, %p566_p2 }
  0x7e   :  { %576 = shalt.err (!%p573_p6)
}
  0x7f   :  { %s577_s10 = scalar_lea.hbm %s834_s2, 1024 }
  0x80   :  { %p578_p7 = scmp.ne.s32.totalorder %s834_s2, %s577_s10  ;;  %p581_p8 = scmp.lt.u32.totalorder %s577_s10, %s834_s2 }
  0x82   :  { %p583_p9 = pnand %p581_p8, %p578_p7 }
  0x84   :  { %586 = shalt.err (!%p583_p9)
}
  0x85   :  { %377 = dma.vmem_to_hbm [thread:$0]  %s375_s6, 1024, %s834_s2, [#allocation7]  }
  0x86   :  { %589 = dma.done.wait [#allocation4], 4096  }
  0x87   :  { %590 = vsyncadd [#allocation4], 4294963200 }
  0x88   :  { %591 = dma.done.wait [#allocation7], 1024  }
  0x89   :  { %592 = vsyncadd [#allocation7], 4294966272 }
  0x8a   :  { %384 = vsyncpa [#allocation3], 1 }
  0x8b   :  { %385 = vsyncpa [#allocation4], 1 }
  0x8c   :  { %386 = vsyncpa [#allocation7], 1 }

</bundles_post_ra>
